<compile_context>
chip_gen: v5e
topology: v5e:2x2
jax: 0.10.0
libtpu: 0.0.40
codegen_flags: <defaults>
</compile_context>

<pallas_src>
import functools

import jax
import jax.numpy as jnp
from jax import lax
from jax.experimental import pallas as pl
from jax.experimental.pallas import tpu as pltpu


LN_EPS = 1e-5
# Exact softmax denominator by default; True uses the EUP vrcp approximation (cheaper,
# co-issues with MXU work, but slightly diverges from jax.nn.softmax).
APPROX_SOFTMAX_RECIP = False


def _transformer_he_kernel(
    q_ref,                      # (1, C, Lq)  f32   channel-major query slice
    k_ref, v_ref,               # (1, Lk, C)  f32
    wq_ref, wk_ref, wv_ref,     # (C, Dh)     bf16  folded projection chains
    wo_ref,                     # (Dh, C)     bf16
    w1_ref,                     # (C, F)      bf16
    w2_ref,                     # (F, C)      bf16
    vec_ref,                    # (8, max(C,F)) f32 packed: bo,g1,be1,b1,b2,g2,be2
    o_ref,                      # (1, C, Lq)
    *, c, f,
):
    f32, bf16 = jnp.float32, jnp.bfloat16

    # Packed small vectors: one DMA for all seven bias/scale rows.
    vec = vec_ref[...]
    bo, g1, be1 = vec[0:1, :c], vec[1:2, :c], vec[2:3, :c]
    b1 = vec[3:4, :f]
    b2, g2, be2 = vec[4:5, :c], vec[5:6, :c], vec[6:7, :c]

    # (C, Lq) -> (Lq, C): in-kernel XLU transpose (replaces the wrapper-side HBM
    # round trip of the NCHW -> NLC permute).
    q_lc = jnp.transpose(q_ref[...][0], (1, 0))                       # (Lq, C) f32
    k_lc = k_ref[...][0]                                              # (Lk, C) f32
    v_lc = v_ref[...][0]

    # Folded bias-free projections: bf16 MXU operands, f32 accumulation.
    q3 = jnp.dot(q_lc.astype(bf16), wq_ref[...], preferred_element_type=f32)  # (Lq, Dh)
    k3 = jnp.dot(k_lc.astype(bf16), wk_ref[...], preferred_element_type=f32)  # (Lk, Dh)
    v3 = jnp.dot(v_lc.astype(bf16), wv_ref[...], preferred_element_type=f32)  # (Lk, Dh)

    # Attention: contract the LAST dims directly (NT form, no k3 transpose
    # materialized); unscaled scores + f32 softmax, matching the PyTorch module.
    dots = lax.dot_general(q3.astype(bf16), k3.astype(bf16),
                           (((1,), (1,)), ((), ())),
                           preferred_element_type=f32)                # (Lq, Lk)
    m = jnp.max(dots, axis=-1, keepdims=True)
    e = jnp.exp(dots - m)
    denom = jnp.sum(e, axis=-1, keepdims=True)
    if APPROX_SOFTMAX_RECIP:
        attn = e * pl.reciprocal(denom, approx=True)
    else:
        attn = e / denom

    ctx = jnp.dot(attn.astype(bf16), v3.astype(bf16),
                  preferred_element_type=f32)                         # (Lq, Dh)
    out = jnp.dot(ctx.astype(bf16), wo_ref[...],
                  preferred_element_type=f32) + bo                    # (Lq, C)

    # Residual + LayerNorm1 (one-pass mean/var so the two XLU reductions can issue
    # back-to-back; f32 VPU math).
    x = q_lc + out
    mu = jnp.mean(x, axis=-1, keepdims=True)
    var = jnp.mean(x * x, axis=-1, keepdims=True) - mu * mu
    x = (x - mu) * lax.rsqrt(var + LN_EPS) * g1 + be1

    # Feed-forward (Linear -> ReLU -> Linear) + Residual + LayerNorm2.
    # TODO(synk): on v6e/v7x the bias+ReLU on the (Lq, F) tensor could run in bf16.
    h = jnp.maximum(
        jnp.dot(x.astype(bf16), w1_ref[...], preferred_element_type=f32) + b1, 0.0)
    ff = jnp.dot(h.astype(bf16), w2_ref[...], preferred_element_type=f32) + b2
    x = x + ff
    mu = jnp.mean(x, axis=-1, keepdims=True)
    var = jnp.mean(x * x, axis=-1, keepdims=True) - mu * mu
    x = (x - mu) * lax.rsqrt(var + LN_EPS) * g2 + be2

    # (Lq, C) -> (C, Lq): write in NCHW channel-major layout so the wrapper only
    # needs a free reshape (no HBM transpose afterwards).
    o_ref[...] = jnp.transpose(x, (1, 0))[None].astype(o_ref.dtype)


def prepare_params(params):
    """One-time parameter preparation, hoisted out of the forward path.

    Folds each stacked bias-free 3-Linear projection chain into a single (C, Dh)
    matrix (exact ONLY because there is no bias / nonlinearity / train-mode dropout
    between them), casts the MXU weights to bf16, and packs the seven small f32
    bias/scale vectors into one (8, max(C, F)) slab (one DMA descriptor).
    """
    (wq1, wq2, wq3, wk1, wk2, wk3, wv1, wv2, wv3,
     wo, bo, g1, be1, w1, b1, w2, b2, g2, be2) = params
    bf16 = jnp.bfloat16
    fold = lambda a, b_, cc: ((a @ b_) @ cc).astype(bf16)

    c = wo.shape[1]
    f = w1.shape[1]
    width = max(c, f)
    vec = jnp.zeros((8, width), jnp.float32)
    for i, row in enumerate((bo, g1, be1, b1, b2, g2, be2)):
        vec = vec.at[i, :row.shape[1]].set(row[0])

    return dict(
        wq=fold(wq1, wq2, wq3), wk=fold(wk1, wk2, wk3), wv=fold(wv1, wv2, wv3),
        wo=wo.astype(bf16), w1=w1.astype(bf16), w2=w2.astype(bf16), vec=vec)


@jax.jit
def transformer_he_layer(query_nchw, key, value, prep):
    """query_nchw: (n, c, h, w); key/value: (n, Lk, c); prep: prepare_params(...).
    Returns (n, c, h, w)."""
    n, c, h, w = query_nchw.shape
    lq = h * w
    lk = key.shape[1]
    f = prep["w1"].shape[1]

    # Contiguous reshape only (free); the NCHW->NLC transpose happens in-kernel.
    q_ncl = query_nchw.reshape(n, c, lq)

    kernel = functools.partial(_transformer_he_kernel, c=c, f=f)
    const = lambda shape: pl.BlockSpec(shape, lambda b: (0,) * len(shape))

    out = pl.pallas_call(
        kernel,
        out_shape=jax.ShapeDtypeStruct((n, c, lq), query_nchw.dtype),
        grid_spec=pltpu.PrefetchScalarGridSpec(
            num_scalar_prefetch=0,
            grid=(n,),
            in_specs=[
                pl.BlockSpec((1, c, lq), lambda b: (b, 0, 0)),   # query (per batch)
                pl.BlockSpec((1, lk, c), lambda b: (b, 0, 0)),   # key
                pl.BlockSpec((1, lk, c), lambda b: (b, 0, 0)),   # value
                const(prep["wq"].shape),                         # weights: constant
                const(prep["wk"].shape),                         #   index maps ->
                const(prep["wv"].shape),                         #   DMA'd once,
                const(prep["wo"].shape),                         #   stay resident
                const(prep["w1"].shape),
                const(prep["w2"].shape),
                const(prep["vec"].shape),                        # packed biases/scales
            ],
            out_specs=pl.BlockSpec((1, c, lq), lambda b: (b, 0, 0)),
        ),
        compiler_params=pltpu.CompilerParams(
            dimension_semantics=("parallel",),       # shards batch across TCs on v7x
            vmem_limit_bytes=32 * 1024 * 1024,
        ),
    )(q_ncl, key, value,
      prep["wq"], prep["wk"], prep["wv"], prep["wo"], prep["w1"], prep["w2"],
      prep["vec"])

    return out.reshape(n, c, h, w)


def make_params(key, d_model, dim_feedforward):
    """Deterministic synthetic params. Linear weights stored (in, out)."""
    Dh = dim_feedforward  # dim_head == dim_feedforward in the module
    ks = jax.random.split(key, 16)
    u = lambda k, shape, s=0.1: (jax.random.uniform(k, shape, jnp.float32) - 0.5) * 2 * s
    wq1 = u(ks[0], (d_model, d_model))
    wq2 = u(ks[1], (d_model, Dh))
    wq3 = u(ks[2], (Dh, Dh))
    wk1 = u(ks[3], (d_model, d_model))
    wk2 = u(ks[4], (d_model, Dh))
    wk3 = u(ks[5], (Dh, Dh))
    wv1 = u(ks[6], (d_model, d_model))
    wv2 = u(ks[7], (d_model, Dh))
    wv3 = u(ks[8], (Dh, Dh))
    wo = u(ks[9], (Dh, d_model))
    bo = u(ks[10], (1, d_model))
    g1 = jnp.ones((1, d_model), jnp.float32)
    be1 = jnp.zeros((1, d_model), jnp.float32)
    w1 = u(ks[11], (d_model, dim_feedforward))
    b1 = u(ks[12], (1, dim_feedforward))
    w2 = u(ks[13], (dim_feedforward, d_model))
    b2 = u(ks[14], (1, d_model))
    g2 = 1.0 + u(ks[15], (1, d_model), 0.05)
    be2 = jnp.zeros((1, d_model), jnp.float32)
    return (wq1, wq2, wq3, wk1, wk2, wk3, wv1, wv2, wv3,
            wo, bo, g1, be1, w1, b1, w2, b2, g2, be2)


def _ln(x, g, b):
    mu = x.mean(-1, keepdims=True)
    var = ((x - mu) ** 2).mean(-1, keepdims=True)
    return (x - mu) * lax.rsqrt(var + LN_EPS) * g + b


def _reference_f32(query_nchw, key, value, params):
    """Pure-JAX f32 reference mirroring the PyTorch forward (eval mode)."""
    (wq1, wq2, wq3, wk1, wk2, wk3, wv1, wv2, wv3,
     wo, bo, g1, be1, w1, b1, w2, b2, g2, be2) = params
    n, c, h, w = query_nchw.shape
    q = jnp.transpose(query_nchw.reshape(n, c, h * w), (0, 2, 1))
    q3 = ((q @ wq1) @ wq2) @ wq3
    k3 = ((key @ wk1) @ wk2) @ wk3
    v3 = ((value @ wv1) @ wv2) @ wv3
    dots = jnp.einsum('bid,bjd->bij', q3, k3)   # unscaled, as in the PyTorch module
    attn = jax.nn.softmax(dots, axis=-1)
    out = jnp.einsum('bij,bjd->bid', attn, v3) @ wo + bo
    x = _ln(q + out, g1, be1)
    ff = jnp.maximum(x @ w1 + b1, 0.0) @ w2 + b2
    x = _ln(x + ff, g2, be2)
    return jnp.transpose(x, (0, 2, 1)).reshape(n, c, h, w)


def _reference_bf16ops(query_nchw, key, value, params):
    """Mirrors the kernel's math (folded bf16 weights, bf16 MXU operands, f32
    accumulation, f32 softmax/LayerNorm) for a tight correctness check."""
    (wq1, wq2, wq3, wk1, wk2, wk3, wv1, wv2, wv3,
     wo, bo, g1, be1, w1, b1, w2, b2, g2, be2) = params
    bf16, f32 = jnp.bfloat16, jnp.float32
    fold = lambda a, b, cc: ((a @ b) @ cc).astype(bf16)
    wq, wk, wv = fold(wq1, wq2, wq3), fold(wk1, wk2, wk3), fold(wv1, wv2, wv3)
    n, c, h, w = query_nchw.shape
    q = jnp.transpose(query_nchw.reshape(n, c, h * w), (0, 2, 1))
    mm = functools.partial(jnp.einsum, preferred_element_type=f32)
    q3 = mm('bic,cd->bid', q.astype(bf16), wq)
    k3 = mm('bic,cd->bid', key.astype(bf16), wk)
    v3 = mm('bic,cd->bid', value.astype(bf16), wv)
    dots = mm('bid,bjd->bij', q3.astype(bf16), k3.astype(bf16))
    attn = jax.nn.softmax(dots, axis=-1)
    ctx = mm('bij,bjd->bid', attn.astype(bf16), v3.astype(bf16))
    out = mm('bid,dc->bic', ctx.astype(bf16), wo.astype(bf16)) + bo
    x = _ln(q + out, g1, be1)
    hdn = jnp.maximum(mm('bic,cf->bif', x.astype(bf16), w1.astype(bf16)) + b1, 0.0)
    ff = mm('bif,fc->bic', hdn.astype(bf16), w2.astype(bf16)) + b2
    x = _ln(x + ff, g2, be2)
    return jnp.transpose(x, (0, 2, 1)).reshape(n, c, h, w)


if __name__ == "__main__":
    n, d_model, h, w = 2, 32, 4, 4
    n_k = 8
    dim_feedforward = 64

    root = jax.random.PRNGKey(0)
    k_q, k_k, k_v, k_p = jax.random.split(root, 4)
    query = jax.random.normal(k_q, (n, d_model, h, w), jnp.float32)
    key = jax.random.normal(k_k, (n, n_k, d_model), jnp.float32)
    value = jax.random.normal(k_v, (n, n_k, d_model), jnp.float32)
    params = make_params(k_p, d_model, dim_feedforward)

    # One-time parameter prep (folding / bf16 casts / bias packing) hoisted out of
    # the forward path.
    prep = jax.block_until_ready(prepare_params(params))

    out = jax.block_until_ready(transformer_he_layer(query, key, value, prep))
    assert out.shape == (n, d_model, h, w)

    # Tight check against a reference using the same bf16-operand / f32-accumulate
    # math as the kernel (validates the kernel itself).
    ref_bf16 = _reference_bf16ops(query, key, value, params)
    assert jnp.allclose(out, ref_bf16, atol=2e-3, rtol=2e-3), \
        "mismatch vs bf16-operand reference"

    # Looser check against the full-f32 PyTorch-style reference (tolerance reflects
    # the intentional bf16 narrowing of MXU operands).
    ref_f32 = _reference_f32(query, key, value, params)
    assert jnp.allclose(out, ref_f32, atol=3e-2, rtol=3e-2), \
        "mismatch vs f32 PyTorch reference"

    print("KERNEL_OK")
</pallas_src>

<mosaic_0001>
module attributes {stable_mosaic.version = 11 : i64} {
  func.func @_transformer_he_kernel(%arg0: i32, %arg1: memref<1x32x16xf32, #tpu.memory_space<vmem>>, %arg2: memref<1x8x32xf32, #tpu.memory_space<vmem>>, %arg3: memref<1x8x32xf32, #tpu.memory_space<vmem>>, %arg4: memref<32x64xbf16, #tpu.memory_space<vmem>>, %arg5: memref<32x64xbf16, #tpu.memory_space<vmem>>, %arg6: memref<32x64xbf16, #tpu.memory_space<vmem>>, %arg7: memref<64x32xbf16, #tpu.memory_space<vmem>>, %arg8: memref<32x64xbf16, #tpu.memory_space<vmem>>, %arg9: memref<64x32xbf16, #tpu.memory_space<vmem>>, %arg10: memref<8x64xf32, #tpu.memory_space<vmem>>, %arg11: memref<1x32x16xf32, #tpu.memory_space<vmem>>) attributes {dimension_semantics = [#tpu.dimension_semantics<parallel>], iteration_bounds = array<i64: 2>, scalar_prefetch = 0 : i64, scratch_operands = 0 : i64, tpu.core_type = #tpu.core_type<tc>, window_params = [{transform_indices = @transform_0, window_bounds = array<i64: 1, 32, 16>}, {transform_indices = @transform_1, window_bounds = array<i64: 1, 8, 32>}, {transform_indices = @transform_2, window_bounds = array<i64: 1, 8, 32>}, {pipeline_mode = #tpu.pipeline_mode<synchronous>, transform_indices = @transform_3, window_bounds = array<i64: 32, 64>}, {pipeline_mode = #tpu.pipeline_mode<synchronous>, transform_indices = @transform_4, window_bounds = array<i64: 32, 64>}, {pipeline_mode = #tpu.pipeline_mode<synchronous>, transform_indices = @transform_5, window_bounds = array<i64: 32, 64>}, {pipeline_mode = #tpu.pipeline_mode<synchronous>, transform_indices = @transform_6, window_bounds = array<i64: 64, 32>}, {pipeline_mode = #tpu.pipeline_mode<synchronous>, transform_indices = @transform_7, window_bounds = array<i64: 32, 64>}, {pipeline_mode = #tpu.pipeline_mode<synchronous>, transform_indices = @transform_8, window_bounds = array<i64: 64, 32>}, {pipeline_mode = #tpu.pipeline_mode<synchronous>, transform_indices = @transform_9, window_bounds = array<i64: 8, 64>}, {transform_indices = @transform_10, window_bounds = array<i64: 1, 32, 16>}]} {
    %c0 = arith.constant 0 : index
    %c0_0 = arith.constant 0 : index
    %0 = vector.load %arg10[%c0, %c0_0] : memref<8x64xf32, #tpu.memory_space<vmem>>, vector<8x64xf32>
    %1 = vector.extract_strided_slice %0 {offsets = [0, 0], sizes = [1, 32], strides = [1, 1]} : vector<8x64xf32> to vector<1x32xf32>
    %2 = vector.extract_strided_slice %0 {offsets = [1, 0], sizes = [1, 32], strides = [1, 1]} : vector<8x64xf32> to vector<1x32xf32>
    %3 = vector.extract_strided_slice %0 {offsets = [2, 0], sizes = [1, 32], strides = [1, 1]} : vector<8x64xf32> to vector<1x32xf32>
    %4 = vector.extract_strided_slice %0 {offsets = [3, 0], sizes = [1, 64], strides = [1, 1]} : vector<8x64xf32> to vector<1x64xf32>
    %5 = vector.extract_strided_slice %0 {offsets = [4, 0], sizes = [1, 32], strides = [1, 1]} : vector<8x64xf32> to vector<1x32xf32>
    %6 = vector.extract_strided_slice %0 {offsets = [5, 0], sizes = [1, 32], strides = [1, 1]} : vector<8x64xf32> to vector<1x32xf32>
    %7 = vector.extract_strided_slice %0 {offsets = [6, 0], sizes = [1, 32], strides = [1, 1]} : vector<8x64xf32> to vector<1x32xf32>
    %c0_1 = arith.constant 0 : index
    %c0_2 = arith.constant 0 : index
    %c0_3 = arith.constant 0 : index
    %8 = vector.load %arg1[%c0_1, %c0_2, %c0_3] : memref<1x32x16xf32, #tpu.memory_space<vmem>>, vector<1x32x16xf32>
    %9 = vector.shape_cast %8 : vector<1x32x16xf32> to vector<32x16xf32>
    %10 = tpu.transpose %9, [1, 0] : vector<32x16xf32> -> vector<16x32xf32>
    %c0_4 = arith.constant 0 : index
    %c0_5 = arith.constant 0 : index
    %c0_6 = arith.constant 0 : index
    %11 = vector.load %arg2[%c0_4, %c0_5, %c0_6] : memref<1x8x32xf32, #tpu.memory_space<vmem>>, vector<1x8x32xf32>
    %12 = vector.shape_cast %11 : vector<1x8x32xf32> to vector<8x32xf32>
    %c0_7 = arith.constant 0 : index
    %c0_8 = arith.constant 0 : index
    %c0_9 = arith.constant 0 : index
    %13 = vector.load %arg3[%c0_7, %c0_8, %c0_9] : memref<1x8x32xf32, #tpu.memory_space<vmem>>, vector<1x8x32xf32>
    %14 = vector.shape_cast %13 : vector<1x8x32xf32> to vector<8x32xf32>
    %15 = arith.truncf %10 : vector<16x32xf32> to vector<16x32xbf16>
    %c0_10 = arith.constant 0 : index
    %c0_11 = arith.constant 0 : index
    %16 = vector.load %arg4[%c0_10, %c0_11] : memref<32x64xbf16, #tpu.memory_space<vmem>>, vector<32x64xbf16>
    %cst = arith.constant dense<0.000000e+00> : vector<16x64xf32>
    %17 = tpu.matmul %15, %16, %cst {dimension_numbers = #tpu.dot_dimension_numbers<[1], [0], [0], [1], [0, 0, 1, 1], [], []>} : vector<16x32xbf16>, vector<32x64xbf16>, vector<16x64xf32> -> vector<16x64xf32>
    %18 = arith.truncf %12 : vector<8x32xf32> to vector<8x32xbf16>
    %c0_12 = arith.constant 0 : index
    %c0_13 = arith.constant 0 : index
    %19 = vector.load %arg5[%c0_12, %c0_13] : memref<32x64xbf16, #tpu.memory_space<vmem>>, vector<32x64xbf16>
    %cst_14 = arith.constant dense<0.000000e+00> : vector<8x64xf32>
    %20 = tpu.matmul %18, %19, %cst_14 {dimension_numbers = #tpu.dot_dimension_numbers<[1], [0], [0], [1], [0, 0, 1, 1], [], []>} : vector<8x32xbf16>, vector<32x64xbf16>, vector<8x64xf32> -> vector<8x64xf32>
    %21 = arith.truncf %14 : vector<8x32xf32> to vector<8x32xbf16>
    %c0_15 = arith.constant 0 : index
    %c0_16 = arith.constant 0 : index
    %22 = vector.load %arg6[%c0_15, %c0_16] : memref<32x64xbf16, #tpu.memory_space<vmem>>, vector<32x64xbf16>
    %cst_17 = arith.constant dense<0.000000e+00> : vector<8x64xf32>
    %23 = tpu.matmul %21, %22, %cst_17 {dimension_numbers = #tpu.dot_dimension_numbers<[1], [0], [0], [1], [0, 0, 1, 1], [], []>} : vector<8x32xbf16>, vector<32x64xbf16>, vector<8x64xf32> -> vector<8x64xf32>
    %24 = arith.truncf %17 : vector<16x64xf32> to vector<16x64xbf16>
    %25 = arith.truncf %20 : vector<8x64xf32> to vector<8x64xbf16>
    %cst_18 = arith.constant dense<0.000000e+00> : vector<16x8xf32>
    %26 = tpu.matmul %24, %25, %cst_18 {dimension_numbers = #tpu.dot_dimension_numbers<[1], [1], [0], [0], [0, 0, 1, 0], [], []>} : vector<16x64xbf16>, vector<8x64xbf16>, vector<16x8xf32> -> vector<16x8xf32>
    %cst_19 = arith.constant dense<0xFF800000> : vector<16xf32>
    %27 = vector.multi_reduction <maximumf>, %26, %cst_19 [1] : vector<16x8xf32> to vector<16xf32>
    %28 = vector.shape_cast %27 : vector<16xf32> to vector<16x1xf32>
    %29 = vector.broadcast %28 : vector<16x1xf32> to vector<16x8xf32>
    %30 = arith.subf %26, %29 : vector<16x8xf32>
    %31 = math.exp %30 : vector<16x8xf32>
    %cst_20 = arith.constant dense<0.000000e+00> : vector<16xf32>
    %32 = vector.multi_reduction <add>, %31, %cst_20 [1] : vector<16x8xf32> to vector<16xf32>
    %33 = vector.shape_cast %32 : vector<16xf32> to vector<16x1xf32>
    %34 = vector.broadcast %33 : vector<16x1xf32> to vector<16x8xf32>
    %35 = arith.divf %31, %34 : vector<16x8xf32>
    %36 = arith.truncf %35 : vector<16x8xf32> to vector<16x8xbf16>
    %37 = arith.truncf %23 : vector<8x64xf32> to vector<8x64xbf16>
    %cst_21 = arith.constant dense<0.000000e+00> : vector<16x64xf32>
    %38 = tpu.matmul %36, %37, %cst_21 {dimension_numbers = #tpu.dot_dimension_numbers<[1], [0], [0], [1], [0, 0, 1, 1], [], []>} : vector<16x8xbf16>, vector<8x64xbf16>, vector<16x64xf32> -> vector<16x64xf32>
    %39 = arith.truncf %38 : vector<16x64xf32> to vector<16x64xbf16>
    %c0_22 = arith.constant 0 : index
    %c0_23 = arith.constant 0 : index
    %40 = vector.load %arg7[%c0_22, %c0_23] : memref<64x32xbf16, #tpu.memory_space<vmem>>, vector<64x32xbf16>
    %cst_24 = arith.constant dense<0.000000e+00> : vector<16x32xf32>
    %41 = tpu.matmul %39, %40, %cst_24 {dimension_numbers = #tpu.dot_dimension_numbers<[1], [0], [0], [1], [0, 0, 1, 1], [], []>} : vector<16x64xbf16>, vector<64x32xbf16>, vector<16x32xf32> -> vector<16x32xf32>
    %42 = vector.broadcast %1 : vector<1x32xf32> to vector<16x32xf32>
    %43 = arith.addf %41, %42 : vector<16x32xf32>
    %44 = arith.addf %10, %43 : vector<16x32xf32>
    %cst_25 = arith.constant dense<0.000000e+00> : vector<16xf32>
    %45 = vector.multi_reduction <add>, %44, %cst_25 [1] : vector<16x32xf32> to vector<16xf32>
    %46 = vector.shape_cast %45 : vector<16xf32> to vector<16x1xf32>
    %cst_26 = arith.constant 3.200000e+01 : f32
    %47 = vector.broadcast %cst_26 : f32 to vector<16x1xf32>
    %48 = arith.divf %46, %47 : vector<16x1xf32>
    %49 = arith.mulf %44, %44 : vector<16x32xf32>
    %cst_27 = arith.constant dense<0.000000e+00> : vector<16xf32>
    %50 = vector.multi_reduction <add>, %49, %cst_27 [1] : vector<16x32xf32> to vector<16xf32>
    %51 = vector.shape_cast %50 : vector<16xf32> to vector<16x1xf32>
    %cst_28 = arith.constant 3.200000e+01 : f32
    %52 = vector.broadcast %cst_28 : f32 to vector<16x1xf32>
    %53 = arith.divf %51, %52 : vector<16x1xf32>
    %54 = arith.mulf %48, %48 : vector<16x1xf32>
    %55 = arith.subf %53, %54 : vector<16x1xf32>
    %56 = vector.broadcast %48 : vector<16x1xf32> to vector<16x32xf32>
    %57 = arith.subf %44, %56 : vector<16x32xf32>
    %cst_29 = arith.constant 9.99999974E-6 : f32
    %58 = vector.broadcast %cst_29 : f32 to vector<16x1xf32>
    %59 = arith.addf %55, %58 : vector<16x1xf32>
    %60 = math.rsqrt %59 : vector<16x1xf32>
    %61 = vector.broadcast %60 : vector<16x1xf32> to vector<16x32xf32>
    %62 = arith.mulf %57, %61 : vector<16x32xf32>
    %63 = vector.broadcast %2 : vector<1x32xf32> to vector<16x32xf32>
    %64 = arith.mulf %62, %63 : vector<16x32xf32>
    %65 = vector.broadcast %3 : vector<1x32xf32> to vector<16x32xf32>
    %66 = arith.addf %64, %65 : vector<16x32xf32>
    %67 = arith.truncf %66 : vector<16x32xf32> to vector<16x32xbf16>
    %c0_30 = arith.constant 0 : index
    %c0_31 = arith.constant 0 : index
    %68 = vector.load %arg8[%c0_30, %c0_31] : memref<32x64xbf16, #tpu.memory_space<vmem>>, vector<32x64xbf16>
    %cst_32 = arith.constant dense<0.000000e+00> : vector<16x64xf32>
    %69 = tpu.matmul %67, %68, %cst_32 {dimension_numbers = #tpu.dot_dimension_numbers<[1], [0], [0], [1], [0, 0, 1, 1], [], []>} : vector<16x32xbf16>, vector<32x64xbf16>, vector<16x64xf32> -> vector<16x64xf32>
    %70 = vector.broadcast %4 : vector<1x64xf32> to vector<16x64xf32>
    %71 = arith.addf %69, %70 : vector<16x64xf32>
    %cst_33 = arith.constant 0.000000e+00 : f32
    %72 = vector.broadcast %cst_33 : f32 to vector<16x64xf32>
    %73 = arith.maximumf %71, %72 : vector<16x64xf32>
    %74 = arith.truncf %73 : vector<16x64xf32> to vector<16x64xbf16>
    %c0_34 = arith.constant 0 : index
    %c0_35 = arith.constant 0 : index
    %75 = vector.load %arg9[%c0_34, %c0_35] : memref<64x32xbf16, #tpu.memory_space<vmem>>, vector<64x32xbf16>
    %cst_36 = arith.constant dense<0.000000e+00> : vector<16x32xf32>
    %76 = tpu.matmul %74, %75, %cst_36 {dimension_numbers = #tpu.dot_dimension_numbers<[1], [0], [0], [1], [0, 0, 1, 1], [], []>} : vector<16x64xbf16>, vector<64x32xbf16>, vector<16x32xf32> -> vector<16x32xf32>
    %77 = vector.broadcast %5 : vector<1x32xf32> to vector<16x32xf32>
    %78 = arith.addf %76, %77 : vector<16x32xf32>
    %79 = arith.addf %66, %78 : vector<16x32xf32>
    %cst_37 = arith.constant dense<0.000000e+00> : vector<16xf32>
    %80 = vector.multi_reduction <add>, %79, %cst_37 [1] : vector<16x32xf32> to vector<16xf32>
    %81 = vector.shape_cast %80 : vector<16xf32> to vector<16x1xf32>
    %cst_38 = arith.constant 3.200000e+01 : f32
    %82 = vector.broadcast %cst_38 : f32 to vector<16x1xf32>
    %83 = arith.divf %81, %82 : vector<16x1xf32>
    %84 = arith.mulf %79, %79 : vector<16x32xf32>
    %cst_39 = arith.constant dense<0.000000e+00> : vector<16xf32>
    %85 = vector.multi_reduction <add>, %84, %cst_39 [1] : vector<16x32xf32> to vector<16xf32>
    %86 = vector.shape_cast %85 : vector<16xf32> to vector<16x1xf32>
    %cst_40 = arith.constant 3.200000e+01 : f32
    %87 = vector.broadcast %cst_40 : f32 to vector<16x1xf32>
    %88 = arith.divf %86, %87 : vector<16x1xf32>
    %89 = arith.mulf %83, %83 : vector<16x1xf32>
    %90 = arith.subf %88, %89 : vector<16x1xf32>
    %91 = vector.broadcast %83 : vector<16x1xf32> to vector<16x32xf32>
    %92 = arith.subf %79, %91 : vector<16x32xf32>
    %cst_41 = arith.constant 9.99999974E-6 : f32
    %93 = vector.broadcast %cst_41 : f32 to vector<16x1xf32>
    %94 = arith.addf %90, %93 : vector<16x1xf32>
    %95 = math.rsqrt %94 : vector<16x1xf32>
    %96 = vector.broadcast %95 : vector<16x1xf32> to vector<16x32xf32>
    %97 = arith.mulf %92, %96 : vector<16x32xf32>
    %98 = vector.broadcast %6 : vector<1x32xf32> to vector<16x32xf32>
    %99 = arith.mulf %97, %98 : vector<16x32xf32>
    %100 = vector.broadcast %7 : vector<1x32xf32> to vector<16x32xf32>
    %101 = arith.addf %99, %100 : vector<16x32xf32>
    %102 = tpu.transpose %101, [1, 0] : vector<16x32xf32> -> vector<32x16xf32>
    %103 = vector.shape_cast %102 : vector<32x16xf32> to vector<1x32x16xf32>
    %c0_42 = arith.constant 0 : index
    %c0_43 = arith.constant 0 : index
    %c0_44 = arith.constant 0 : index
    %104 = vector.load %arg11[%c0_42, %c0_43, %c0_44] : memref<1x32x16xf32, #tpu.memory_space<vmem>>, vector<1x32x16xf32>
    tpu.vector_store %arg11[%c0_42, %c0_43, %c0_44], %103 {strides = array<i32>} : memref<1x32x16xf32, #tpu.memory_space<vmem>>, vector<1x32x16xf32>,
    return
  }
  func.func @transform_0(%arg0: i32) -> (i32, i32, i32) {
    %c0_i32 = arith.constant 0 : i32
    %c0_i32_0 = arith.constant 0 : i32
    %c0_i32_1 = arith.constant 0 : i32
    return %arg0, %c0_i32, %c0_i32_0 : i32, i32, i32
  }
  func.func @transform_1(%arg0: i32) -> (i32, i32, i32) {
    %c0_i32 = arith.constant 0 : i32
    %c0_i32_0 = arith.constant 0 : i32
    %c0_i32_1 = arith.constant 0 : i32
    return %arg0, %c0_i32, %c0_i32_0 : i32, i32, i32
  }
  func.func @transform_2(%arg0: i32) -> (i32, i32, i32) {
    %c0_i32 = arith.constant 0 : i32
    %c0_i32_0 = arith.constant 0 : i32
    %c0_i32_1 = arith.constant 0 : i32
    return %arg0, %c0_i32, %c0_i32_0 : i32, i32, i32
  }
  func.func @transform_3(%arg0: i32) -> (i32, i32) {
    %c0_i32 = arith.constant 0 : i32
    %c0_i32_0 = arith.constant 0 : i32
    %c0_i32_1 = arith.constant 0 : i32
    return %c0_i32, %c0_i32_0 : i32, i32
  }
  func.func @transform_4(%arg0: i32) -> (i32, i32) {
    %c0_i32 = arith.constant 0 : i32
    %c0_i32_0 = arith.constant 0 : i32
    %c0_i32_1 = arith.constant 0 : i32
    return %c0_i32, %c0_i32_0 : i32, i32
  }
  func.func @transform_5(%arg0: i32) -> (i32, i32) {
    %c0_i32 = arith.constant 0 : i32
    %c0_i32_0 = arith.constant 0 : i32
    %c0_i32_1 = arith.constant 0 : i32
    return %c0_i32, %c0_i32_0 : i32, i32
  }
  func.func @transform_6(%arg0: i32) -> (i32, i32) {
    %c0_i32 = arith.constant 0 : i32
    %c0_i32_0 = arith.constant 0 : i32
    %c0_i32_1 = arith.constant 0 : i32
    return %c0_i32, %c0_i32_0 : i32, i32
  }
  func.func @transform_7(%arg0: i32) -> (i32, i32) {
    %c0_i32 = arith.constant 0 : i32
    %c0_i32_0 = arith.constant 0 : i32
    %c0_i32_1 = arith.constant 0 : i32
    return %c0_i32, %c0_i32_0 : i32, i32
  }
  func.func @transform_8(%arg0: i32) -> (i32, i32) {
    %c0_i32 = arith.constant 0 : i32
    %c0_i32_0 = arith.constant 0 : i32
    %c0_i32_1 = arith.constant 0 : i32
    return %c0_i32, %c0_i32_0 : i32, i32
  }
  func.func @transform_9(%arg0: i32) -> (i32, i32) {
    %c0_i32 = arith.constant 0 : i32
    %c0_i32_0 = arith.constant 0 : i32
    %c0_i32_1 = arith.constant 0 : i32
    return %c0_i32, %c0_i32_0 : i32, i32
  }
  func.func @transform_10(%arg0: i32) -> (i32, i32, i32) {
    %c0_i32 = arith.constant 0 : i32
    %c0_i32_0 = arith.constant 0 : i32
    %c0_i32_1 = arith.constant 0 : i32
    return %arg0, %c0_i32, %c0_i32_0 : i32, i32, i32
  }
}

</mosaic_0001>

<bundles_post_ra>
// kernel: transformer_he_layer.1
= control target key start
LH: loop header
LB: loop body
LE: loop exit
PB: predicated region body
PF: predicated region fallthrough
CT: control target
= control target key end

     0   :  { %s1199_s13 = smov 0   ;;  %s1341_s0 = inlined_call_operand.vmem [shape: f32[2,32,16], index: 0, kind: input, shape index: {}]   ;;  %s1342_s1 = inlined_call_operand.vmem [shape: f32[2,8,32], index: 1, kind: input, shape index: {}]   ;;  %s1343_s2 = inlined_call_operand.vmem [shape: f32[2,8,32], index: 2, kind: input, shape index: {}]   ;;  %s1344_s3 = inlined_call_operand.vmem [shape: bf16[32,64], index: 3, kind: input, shape index: {}]   ;;  %s1345_s4 = inlined_call_operand.vmem [shape: bf16[32,64], index: 4, kind: input, shape index: {}]   ;;  %s1346_s5 = inlined_call_operand.vmem [shape: bf16[32,64], index: 5, kind: input, shape index: {}]   ;;  %s1347_s6 = inlined_call_operand.vmem [shape: bf16[64,32], index: 6, kind: input, shape index: {}]   ;;  %s1348_s7 = inlined_call_operand.vmem [shape: bf16[32,64], index: 7, kind: input, shape index: {}]   ;;  %s1349_s8 = inlined_call_operand.vmem [shape: bf16[64,32], index: 8, kind: input, shape index: {}]   ;;  %s1350_s9 = inlined_call_operand.vmem [shape: f32[8,64], index: 9, kind: input, shape index: {}]   ;;  %s1351_s10 = inlined_call_operand.vmem [shape: f32[2,32,16], index: 10, kind: output, shape index: {}]  }
   0x1 LB: > { %s1004_s14 = sadd.s32 4294967295, %s1141_s13   ;;  %p1008_p0 = scmp.ge.s32.totalorder %s1141_s13, 1  ;;  %s1141_s13 = sphi %s1199_s13, %s20_s13  }
   0x2   : > { %p330_p1 = scmp.lt.s32.totalorder %s1141_s13, 3 }
   0x4   : > { %p331_p2 = pnand %p1008_p0, %p330_p1 }
   0x5   : > { %p376_p3 = scmp.lt.s32.totalorder (!%p331_p2), %s1004_s14, 1 }
   0x6   : > { %334 = sbr.rel (%p331_p2) target bundleno = 1773 (0x6ed), region = 60 }
   0xb   : > { %v1094_v0 = vld [vmem:[%s1345_s4 + $0x8] sm:$0xff]  ;;  %s1353_s14 = smov (!%p376_p3, %s1004_s14), 1  ;;  %v1093_v1 = vld [vmem:[%s1345_s4] sm:$0xff]  ;;  %vm451_vm0 = vcmask 261120   ;;  %vm537_vm1 = vcmask 523264   ;;  %vm558_vm2 = vcmask 64512  }
   0xc   : > { %495 = vmatpush.bf16.msra.mxu1 %v1094_v0  ;;  %s1089_s19 = sshll.u32 %s1353_s14, 5  ;;  %s1011_s23 = sshll.u32 %s1353_s14, 3  ;;  %v1092_v7 = vld [vmem:[%s1344_s3 + $0x8] sm:$0xff]  ;;  %v1091_v9 = vld [vmem:[%s1344_s3] sm:$0xff]  ;;  %vm612_vm3 = vcmask 1043456   ;;  %v1100_v42 = vld [vmem:[%s1347_s6 + $0x18] sm:$0xff] }
   0xd   : > { %s380_s22 = scalar_lea.vmem %s1341_s0, %s1089_s19  ;;  %s384_s26 = scalar_lea.vmem %s1342_s1, %s1011_s23  ;;  %461 = vmatpush.bf16.msra.mxu0 %v1092_v7  ;;  %v1096_v20 = vld [vmem:[%s1346_s5 + $0x8] sm:$0xff]  ;;  %v1095_v21 = vld [vmem:[%s1346_s5] sm:$0xff]  ;;  %v1099_v44 = vld [vmem:[%s1347_s6 + $0x10] sm:$0xff] }
   0xe   : > { %v396_v2 = vld [vmem:[%s380_s22] sm:$0xff]  ;;  %v397_v3 = vld [vmem:[%s380_s22 + $0x8] sm:$0xff]  ;;  %v398_v4 = vld [vmem:[%s380_s22 + $0x10] sm:$0xff]  ;;  %s388_s15 = scalar_lea.vmem %s1343_s2, %s1011_s23  ;;  %528 = vmatpush.bf16.msra.mxu2 %v1096_v20  ;;  %s393_s28 = scalar_lea.vmem %s1351_s10, %s1089_s19 }
   0xf   : > { %400 = vxpose.xlu0.b32.start [1/4] (short) (narrow) %v396_v2, 16  ;;  %v399_v5 = vld [vmem:[%s380_s22 + $0x18] sm:$0xff]  ;;  %v432_v6 = vld [vmem:[%s384_s26] sm:$0xff] }
  0x10   : > { %496 = vmatpush.bf16.msra.mxu1 %v1093_v1  ;;  %v469_v8 = vpack.c.bf16 %v432_v6, %v432_v6  ;;  %v433_v22 = vld [vmem:[%s388_s15] sm:$0xff] }
  0x11   : > { %462 = vmatpush.bf16.msra.mxu0 %v1091_v9  ;;  %v502_v23 = vpack.c.bf16 %v433_v22, %v433_v22  ;;  %v1097_v6 = vld [vmem:[%s1347_s6] sm:$0xff] }
  0x12   : > { %529 = vmatpush.bf16.msra.mxu2 %v1095_v21 }
  0x13   : > { %1032 = vmatmul.msk.bf16.vlgmr.msra.gmra.mxu1 %vm451_vm0, %v469_v8 }
  0x14   : > { %671 = vmatpush.bf16.msrb.mxu1 %v1100_v42 }
  0x15   : > { %1041 = vmatmul.msk.bf16.vlgmr.msra.gmra.mxu2 %vm451_vm0, %v502_v23 }
  0x17   : > { %401 = vxpose.xlu0.b32.cont [2/4] (short) (narrow) %v397_v3, 16 }
  0x18   : > { %672 = vmatpush.bf16.msrb.mxu1 %v1099_v44 }
  0x1f   : > { %402 = vxpose.xlu0.b32.cont [3/4] (short) (narrow) %v398_v4, 16 }
  0x27   : > { %403 = vxpose.xlu0.b32.end [4/4] (short) (narrow) %v399_v5, 16  ;;  %v1098_v5 = vld [vmem:[%s1347_s6 + $0x8] sm:$0xff] }
  0x28   : > { %673 = vmatpush.bf16.msrb.mxu1 %v1098_v5 }
  0x2c   : > { %674 = vmatpush.bf16.msrb.mxu1 %v1097_v6 }
  0x90   : > { %v498_v13 = vpop.f32.mrf.mxu1 }
  0x91   : > { %v536_v14 = vpack.c.bf16 %v498_v13, %v498_v13 }
  0x93   : > { %v542_v16 = vsel %vm537_vm1, %v536_v14, 0 }
  0x94   : > { %551 = vmatpush.bf16.xpose.msra.mxu3 %v542_v16 }
  0x98   : > { %v500_v15 = vpop.f32.mrf.mxu1  ;;  %v531_v38 = vpop.f32.mrf.mxu2 }
  0x99   : > { %v608_v39 = vpack.c.bf16 %v531_v38, %v531_v38  ;;  %v1101_v38 = vld [vmem:[%s1348_s7] sm:$0xff] }
  0x9b   : > { %v614_v41 = vsel %vm612_vm3, %v608_v39, 0 }
  0x9c   : > { %623 = vmatpush.bf16.msrb.mxu0 %v614_v41 }
  0xa0   : > { %v533_v40 = vpop.f32.mrf.mxu2 }
  0xb3   : > { %v1232_v10 = vpop.trf.xlu0 }
  0xbb   : > { %v1234_v11 = vpop.trf.xlu0 }
  0xbc   : > { %v434_v12 = vpack.c.bf16 %v1234_v11, %v1232_v10 }
  0xbe   : > { %1023 = vmatmul.msk.bf16.vlgmr.msra.gmra.mxu0 %vm451_vm0, %v434_v12  ;;  %v1272_v12 = vld [vmem:[%s1350_s9] sm:$0xff] }
  0xbf   : > { %v639_v13 = vperm.slane %v1272_v12, 0 }
 0x13b   : > { %v464_v17 = vpop.f32.mrf.mxu0 }
 0x143   : > { %v466_v18 = vpop.f32.mrf.mxu0 }
 0x144   : > { %v535_v19 = vpack.c.bf16 %v466_v18, %v464_v17 }
 0x146   : > { %1042 = vmatmul.msk.bf16.vlgmr.msra.gmra.mxu3 %vm537_vm1, %v535_v19 }
 0x1c9   : > { %v553_v24 = vpop.f32.mrf.mxu3 }
 0x1ca   : > { %v559_v25 = vsel %vm558_vm2, %v553_v24, -inf }
 0x1cb   : > { %560 = vmax.xlane.f32.xlu1 %v559_v25  ;;  %v1143_v25 = vmov 32.0  }
 0x1d1   : > { %v555_v26 = vpop.f32.mrf.mxu3 }
 0x1d2   : > { %v562_v27 = vsel %vm558_vm2, %v555_v26, -inf }
 0x1d3   : > { %563 = vmax.xlane.f32.xlu1 %v562_v27 }
 0x23e   : > { %v561_v28 = vpop.xlane.xlu1 %560 }
 0x23f   : > { %v565_v29 = vsub.f32 %v553_v24, %v561_v28 }
 0x241   : > { %v567_v30 = vmul.f32 1.442695, %v565_v29 }
 0x243   : > { %1117 = vpow2.f32 %v567_v30 }
 0x246   : > { %v564_v31 = vpop.xlane.xlu1 %563 }
 0x247   : > { %v566_v32 = vsub.f32 %v555_v26, %v564_v31 }
 0x249   : > { %v1118_v33 = vpop.eup %1117  ;;  %v569_v34 = vmul.f32 1.442695, %v566_v32 }
 0x24a   : > { %v571_v35 = vsel %vm558_vm2, %v1118_v33, 0.0 }
 0x24b   : > { %1119 = vpow2.f32 %v569_v34  ;;  %572 = vadd.xlane.f32.xlu2 %v571_v35  ;;  %v1102_v35 = vld [vmem:[%s1348_s7 + $0x8] sm:$0xff] }
 0x24c   : > { %771 = vmatpush.bf16.msrb.mxu2 %v1102_v35 }
 0x250   : > { %772 = vmatpush.bf16.msrb.mxu2 %v1101_v38 }
 0x251   : > { %v1120_v36 = vpop.eup %1119 }
 0x252   : > { %v574_v37 = vsel %vm558_vm2, %v1120_v36, 0.0 }
 0x253   : > { %575 = vadd.xlane.f32.xlu2 %v574_v37 }
 0x2be   : > { %v573_v43 = vpop.xlane.xlu2 %572 }
 0x2bf   : > { %1121 = vrcp.f32 %v573_v43  ;;  %v588_v53 = vand.u32 2147483648, %v573_v43  ;;  %vm582_vm5 = vweird.f32 %v573_v43  ;;  %v586_v54 = vand.u32 2147483647, %v573_v43 }
 0x2c1   : > { %v589_v60 = vor.u32 1.1754944e-38, %v588_v53  ;;  %vm587_vm8 = vcmp.eq.f32.partialorder %v586_v54, 8.507059e+37 }
 0x2c5   : > { %v1122_v45 = vpop.eup %1121 }
 0x2c6   : > { %v578_v46 = vmul.f32 %v1122_v45, %v573_v43  ;;  %v576_v47 = vpop.xlane.xlu2 %575  ;;  %vm583_vm4 = vweird.f32 %v1122_v45 }
 0x2c7   : > { %1123 = vrcp.f32 %v576_v47  ;;  %vm584_vm6 = vmor %vm582_vm5, %vm583_vm4  ;;  %v603_v56 = vand.u32 2147483648, %v576_v47  ;;  %v601_v59 = vand.u32 2147483647, %v576_v47  ;;  %vm597_vm9 = vweird.f32 %v576_v47 }
 0x2c8   : > { %v579_v48 = vsub.f32 1.0, %v578_v46  ;;  %1125 = vrcp.f32 %v1143_v25 }
 0x2c9   : > { %v604_v62 = vor.u32 1.1754944e-38, %v603_v56  ;;  %vm602_vm11 = vcmp.eq.f32.partialorder %v601_v59, 8.507059e+37 }
 0x2ca   : > { %v580_v49 = vmul.f32 %v1122_v45, %v579_v48 }
 0x2cc   : > { %v581_v51 = vadd.f32 %v1122_v45, %v580_v49 }
 0x2cd   : > { %v1124_v50 = vpop.eup %1123 }
 0x2ce   : > { %v593_v52 = vmul.f32 %v1124_v50, %v576_v47  ;;  %v585_v57 = vsel %vm584_vm6, %v1122_v45, %v581_v51  ;;  %vm598_vm7 = vweird.f32 %v1124_v50  ;;  %v1126_v26 = vpop.eup %1125  ;;  %v1106_v45 = vld [vmem:[%s1349_s8 + $0x18] sm:$0xff] }
 0x2cf   : > { %vm599_vm10 = vmor %vm597_vm9, %vm598_vm7  ;;  %v590_v63 = vsel %vm587_vm8, %v589_v60, %v585_v57  ;;  %v690_v27 = vmul.f32 32.0, %v1126_v26  ;;  %vm694_vm12 = vweird.f32 %v1126_v26  ;;  %822 = vmatpush.bf16.msrb.mxu3 %v1106_v45  ;;  %vm920_vm9 = vcmask 130048  }
 0x2d0   : > { %v594_v55 = vsub.f32 1.0, %v593_v52  ;;  %v591_v2 = vmul.f32 %v1118_v33, %v590_v63 }
 0x2d1   : > { %v691_v28 = vsub.f32 1.0, %v690_v27 }
 0x2d2   : > { %v595_v58 = vmul.f32 %v1124_v50, %v594_v55 }
 0x2d4   : > { %v596_v61 = vadd.f32 %v1124_v50, %v595_v58 }
 0x2d6   : > { %v600_v0 = vsel %vm599_vm10, %v1124_v50, %v596_v61 }
 0x2d7   : > { %v605_v1 = vsel %vm602_vm11, %v604_v62, %v600_v0  ;;  %v738_v62 = vperm.slane %v1272_v12, 1 }
 0x2d8   : > { %v606_v3 = vmul.f32 %v1120_v36, %v605_v1 }
 0x2da   : > { %v607_v4 = vpack.c.bf16 %v606_v3, %v591_v2 }
 0x2dc   : > { %1043 = vmatmul.msk.bf16.vlgmr.msrb.gmra.mxu0 %vm558_vm2, %v607_v4  ;;  %v741_v4 = vperm.slane %v1272_v12, 2 }
 0x359   : > { %v625_v7 = vpop.f32.mrf.mxu0 }
 0x361   : > { %v627_v8 = vpop.f32.mrf.mxu0 }
 0x362   : > { %v630_v9 = vpack.c.bf16 %v627_v8, %v625_v7 }
 0x364   : > { %1060 = vmatmul.msk.bf16.vlgmr.msrb.gmra.mxu1 %vm537_vm1, %v630_v9  ;;  %v1105_v9 = vld [vmem:[%s1349_s8 + $0x10] sm:$0xff] }
 0x365   : > { %823 = vmatpush.bf16.msrb.mxu3 %v1105_v9 }
 0x3e1   : > { %v676_v14 = vpop.f32.mrf.mxu1 }
 0x3e2   : > { %v677_v15 = vadd.f32 %v676_v14, %v639_v13  ;;  %v1103_v14 = vld [vmem:[%s1349_s8] sm:$0xff] }
 0x3e4   : > { %v1276_v16 = vadd.f32 %v677_v15, %v1232_v10 }
 0x3e6   : > { %v683_v17 = vsel %vm451_vm0, %v1276_v16, 0.0  ;;  %v698_v20 = vmul.f32 %v1276_v16, %v1276_v16 }
 0x3e7   : > { %684 = vadd.xlane.f32.xlu1 %v683_v17 }
 0x3e8   : > { %v700_v23 = vsel %vm451_vm0, %v698_v20, 0.0 }
 0x3e9   : > { %v678_v18 = vpop.f32.mrf.mxu1 }
 0x3ea   : > { %v679_v19 = vadd.f32 %v678_v18, %v639_v13  ;;  %v1104_v13 = vld [vmem:[%s1349_s8 + $0x8] sm:$0xff] }
 0x3eb   : > { %824 = vmatpush.bf16.msrb.mxu3 %v1104_v13 }
 0x3ec   : > { %v1283_v21 = vadd.f32 %v679_v19, %v1234_v11  ;;  %v692_v11 = vmul.f32 %v1126_v26, %v691_v28 }
 0x3ee   : > { %v686_v22 = vsel %vm451_vm0, %v1283_v21, 0.0  ;;  %v699_v10 = vmul.f32 %v1283_v21, %v1283_v21  ;;  %v693_v29 = vadd.f32 %v1126_v26, %v692_v11 }
 0x3ef   : > { %687 = vadd.xlane.f32.xlu2 %v686_v22  ;;  %701 = vadd.xlane.f32.xlu1 %v700_v23  ;;  %v790_v23 = vperm.slane %v1272_v12, 4 }
 0x3f0   : > { %v703_v24 = vsel %vm451_vm0, %v699_v10, 0.0  ;;  %v1291_v31 = vsel %vm694_vm12, %v1126_v26, %v693_v29  ;;  %825 = vmatpush.bf16.msrb.mxu3 %v1103_v14 }
 0x3f7   : > { %704 = vadd.xlane.f32.xlu2 %v703_v24 }
 0x45a   : > { %v685_v30 = vpop.xlane.xlu1 %684 }
 0x45b   : > { %v696_v32 = vmul.f32 %v1291_v31, %v685_v30 }
 0x45d   : > { %v708_v36 = vmul.f32 %v696_v32, %v696_v32  ;;  %v712_v59 = vsub.f32 %v1276_v16, %v696_v32  ;;  %v749_v16 = vperm.slane %v1272_v12, 3 }
 0x462   : > { %v688_v33 = vpop.xlane.xlu2 %687  ;;  %v702_v34 = vpop.xlane.xlu1 %701 }
 0x463   : > { %v706_v37 = vmul.f32 %v702_v34, %v1291_v31  ;;  %v697_v40 = vmul.f32 %v1291_v31, %v688_v33 }
 0x465   : > { %v710_v39 = vsub.f32 %v706_v37, %v708_v36  ;;  %v709_v43 = vmul.f32 %v697_v40, %v697_v40  ;;  %v713_v0 = vsub.f32 %v1283_v21, %v697_v40 }
 0x467   : > { %v714_v41 = vadd.f32 1e-05, %v710_v39 }
 0x469   : > { %1127 = vrsqrt.f32 %v714_v41  ;;  %vm722_vm14 = vweird.f32 %v714_v41 }
 0x46a   : > { %v705_v42 = vpop.xlane.xlu2 %704 }
 0x46b   : > { %v707_v44 = vmul.f32 %v705_v42, %v1291_v31 }
 0x46d   : > { %v711_v46 = vsub.f32 %v707_v44, %v709_v43 }
 0x46f   : > { %v1128_v47 = vpop.eup %1127  ;;  %v715_v48 = vadd.f32 1e-05, %v711_v46 }
 0x470   : > { %v717_v49 = vmul.f32 %v1128_v47, %v714_v41  ;;  %vm723_vm13 = vweird.f32 %v1128_v47 }
 0x471   : > { %1129 = vrsqrt.f32 %v715_v48  ;;  %vm724_vm15 = vmor %vm722_vm14, %vm723_vm13  ;;  %vm732_vm3 = vweird.f32 %v715_v48 }
 0x472   : > { %v718_v50 = vmul.f32 %v1128_v47, %v717_v49 }
 0x474   : > { %v719_v51 = vmul.f32 0.5, %v718_v50 }
 0x476   : > { %v720_v52 = vsub.f32 1.5, %v719_v51 }
 0x477   : > { %v1130_v53 = vpop.eup %1129 }
 0x478   : > { %v721_v54 = vmul.f32 %v1128_v47, %v720_v52  ;;  %v727_v55 = vmul.f32 %v1130_v53, %v715_v48  ;;  %vm733_vm2 = vweird.f32 %v1130_v53 }
 0x479   : > { %vm734_vm4 = vmor %vm732_vm3, %vm733_vm2 }
 0x47a   : > { %v728_v56 = vmul.f32 %v1130_v53, %v727_v55  ;;  %v725_v57 = vsel %vm724_vm15, %v1128_v47, %v721_v54 }
 0x47b   : > { %v736_v61 = vmul.f32 %v725_v57, %v712_v59 }
 0x47c   : > { %v729_v58 = vmul.f32 0.5, %v728_v56 }
 0x47d   : > { %v739_v3 = vmul.f32 %v738_v62, %v736_v61  ;;  %v885_v61 = vperm.slane %v1272_v12, 6 }
 0x47e   : > { %v730_v60 = vsub.f32 1.5, %v729_v58  ;;  %v882_v58 = vperm.slane %v1272_v12, 5 }
 0x47f   : > { %v742_v6 = vadd.f32 %v741_v4, %v739_v3 }
 0x480   : > { %v731_v63 = vmul.f32 %v1130_v53, %v730_v60 }
 0x482   : > { %v735_v1 = vsel %vm734_vm4, %v1130_v53, %v731_v63 }
 0x483   : > { %v737_v2 = vmul.f32 %v735_v1, %v713_v0 }
 0x485   : > { %v740_v5 = vmul.f32 %v738_v62, %v737_v2 }
 0x487   : > { %v743_v7 = vadd.f32 %v741_v4, %v740_v5 }
 0x489   : > { %v744_v8 = vpack.c.bf16 %v743_v7, %v742_v6 }
 0x48b   : > { %1069 = vmatmul.msk.bf16.vlgmr.msrb.gmra.mxu2 %vm451_vm0, %v744_v8 }
 0x50e   : > { %v774_v15 = vpop.f32.mrf.mxu2 }
 0x50f   : > { %v775_v17 = vadd.f32 %v774_v15, %v749_v16 }
 0x511   : > { %v779_v20 = vmax.f32 %v775_v17, 0.0 }
 0x516   : > { %v776_v18 = vpop.f32.mrf.mxu2 }
 0x517   : > { %v777_v19 = vadd.f32 %v776_v18, %v749_v16 }
 0x519   : > { %v780_v21 = vmax.f32 %v777_v19, 0.0 }
 0x51b   : > { %v781_v22 = vpack.c.bf16 %v780_v21, %v779_v20 }
 0x51d   : > { %1086 = vmatmul.msk.bf16.vlgmr.msrb.gmra.mxu3 %vm537_vm1, %v781_v22 }
 0x5a0   : > { %v827_v10 = vpop.f32.mrf.mxu3 }
 0x5a1   : > { %v828_v24 = vadd.f32 %v827_v10, %v790_v23 }
 0x5a3   : > { %v832_v25 = vadd.f32 %v828_v24, %v742_v6 }
 0x5a5   : > { %v834_v26 = vsel %vm451_vm0, %v832_v25, 0.0  ;;  %v842_v27 = vmul.f32 %v832_v25, %v832_v25 }
 0x5a6   : > { %835 = vadd.xlane.f32.xlu0 %v834_v26 }
 0x5a7   : > { %v844_v28 = vsel %vm451_vm0, %v842_v27, 0.0 }
 0x5a8   : > { %v829_v11 = vpop.f32.mrf.mxu3  ;;  %845 = vadd.xlane.f32.xlu1 %v844_v28 }
 0x5a9   : > { %v830_v29 = vadd.f32 %v829_v11, %v790_v23 }
 0x5ab   : > { %v833_v30 = vadd.f32 %v830_v29, %v743_v7 }
 0x5ad   : > { %v837_v32 = vsel %vm451_vm0, %v833_v30, 0.0  ;;  %v843_v33 = vmul.f32 %v833_v30, %v833_v30 }
 0x5ae   : > { %838 = vadd.xlane.f32.xlu2 %v837_v32 }
 0x5af   : > { %v847_v34 = vsel %vm451_vm0, %v843_v33, 0.0 }
 0x5b0   : > { %848 = vadd.xlane.f32.xlu1 %v847_v34 }
 0x619   : > { %v836_v35 = vpop.xlane.xlu0 %835 }
 0x61a   : > { %v840_v36 = vmul.f32 %v836_v35, %v1291_v31 }
 0x61b   : > { %v846_v37 = vpop.xlane.xlu1 %845 }
 0x61c   : > { %v852_v38 = vmul.f32 %v840_v36, %v840_v36  ;;  %v850_v39 = vmul.f32 %v846_v37, %v1291_v31  ;;  %v856_v57 = vsub.f32 %v832_v25, %v840_v36 }
 0x61e   : > { %v854_v40 = vsub.f32 %v850_v39, %v852_v38 }
 0x620   : > { %v858_v41 = vadd.f32 1e-05, %v854_v40 }
 0x621   : > { %v839_v42 = vpop.xlane.xlu2 %838 }
 0x622   : > { %1131 = vrsqrt.f32 %v858_v41  ;;  %v841_v43 = vmul.f32 %v839_v42, %v1291_v31  ;;  %vm866_vm1 = vweird.f32 %v858_v41 }
 0x623   : > { %v849_v44 = vpop.xlane.xlu1 %848 }
 0x624   : > { %v853_v45 = vmul.f32 %v841_v43, %v841_v43  ;;  %v851_v46 = vmul.f32 %v849_v44, %v1291_v31  ;;  %v857_v3 = vsub.f32 %v833_v30, %v841_v43 }
 0x626   : > { %v855_v47 = vsub.f32 %v851_v46, %v853_v45 }
 0x628   : > { %v1132_v48 = vpop.eup %1131  ;;  %v859_v49 = vadd.f32 1e-05, %v855_v47 }
 0x629   : > { %v861_v50 = vmul.f32 %v1132_v48, %v858_v41  ;;  %vm867_vm0 = vweird.f32 %v1132_v48 }
 0x62a   : > { %1133 = vrsqrt.f32 %v859_v49  ;;  %vm868_vm5 = vmor %vm866_vm1, %vm867_vm0  ;;  %vm876_vm7 = vweird.f32 %v859_v49 }
 0x62b   : > { %v862_v51 = vmul.f32 %v1132_v48, %v861_v50 }
 0x62d   : > { %v863_v52 = vmul.f32 0.5, %v862_v51 }
 0x62f   : > { %v864_v53 = vsub.f32 1.5, %v863_v52 }
 0x630   : > { %v1134_v54 = vpop.eup %1133 }
 0x631   : > { %v871_v55 = vmul.f32 %v1134_v54, %v859_v49  ;;  %v865_v56 = vmul.f32 %v1132_v48, %v864_v53  ;;  %vm877_vm6 = vweird.f32 %v1134_v54 }
 0x632   : > { %vm878_vm8 = vmor %vm876_vm7, %vm877_vm6 }
 0x633   : > { %v872_v59 = vmul.f32 %v1134_v54, %v871_v55  ;;  %v869_v60 = vsel %vm868_vm5, %v1132_v48, %v865_v56 }
 0x634   : > { %v880_v31 = vmul.f32 %v869_v60, %v856_v57 }
 0x635   : > { %v873_v62 = vmul.f32 0.5, %v872_v59 }
 0x636   : > { %v883_v63 = vmul.f32 %v882_v58, %v880_v31 }
 0x637   : > { %v874_v0 = vsub.f32 1.5, %v873_v62 }
 0x638   : > { %v886_v1 = vadd.f32 %v885_v61, %v883_v63 }
 0x639   : > { %v875_v2 = vmul.f32 %v1134_v54, %v874_v0 }
 0x63a   : > { %888 = vxpose.xlu2.b32.start [1/2] (short) (narrow) %v886_v1, 32 }
 0x63b   : > { %v879_v4 = vsel %vm878_vm8, %v1134_v54, %v875_v2 }
 0x63c   : > { %v881_v5 = vmul.f32 %v879_v4, %v857_v3 }
 0x63e   : > { %v884_v6 = vmul.f32 %v882_v58, %v881_v5 }
 0x640   : > { %v887_v7 = vadd.f32 %v885_v61, %v884_v6 }
 0x642   : > { %889 = vxpose.xlu2.b32.end [2/2] (short) (narrow) %v887_v7, 32 }
 0x6d3   : > { %v904_v12 = vpop.trf.xlu2 }
 0x6d4   : > { %921 = vst.msk [vmem:[%s393_s28] sm:$0xff] %vm920_vm9, %v904_v12 }
 0x6db   : > { %v905_v8 = vpop.trf.xlu2 }
 0x6dc   : > { %922 = vst.msk [vmem:[%s393_s28 + $0x8] sm:$0xff] %vm920_vm9, %v905_v8 }
 0x6e3   : > { %v906_v9 = vpop.trf.xlu2 }
 0x6e4   : > { %923 = vst.msk [vmem:[%s393_s28 + $0x10] sm:$0xff] %vm920_vm9, %v906_v9 }
 0x6eb   : > { %v907_v13 = vpop.trf.xlu2 }
 0x6ec   : > { %924 = vst.msk [vmem:[%s393_s28 + $0x18] sm:$0xff] %vm920_vm9, %v907_v13 }
 0x6ed PF: > { %s20_s13 = sadd.s32 1, %s1141_s13  }
 0x6ee   : > { %p17_p4 = scmp.ge.s32.totalorder %s20_s13, 4  }
 0x6f0   :  { %19 = sbr.rel (!%p17_p4) target bundleno = 1 (0x1), region = 96 }

</bundles_post_ra>
